<compile_context>
chip_gen: v5e
topology: v5e:2x2
jax: 0.10.0
libtpu: 0.0.40
codegen_flags: <defaults>
</compile_context>

<pallas_src>
import math

import jax
import jax.numpy as jnp
from jax.experimental import pallas as pl
from jax.experimental.pallas import tpu as pltpu


def _interp_matrix(in_size: int, out_size: int, dtype=jnp.float32):
    """Linear interpolation matrix (out_size, in_size), align_corners=True.

    Matches torch.nn.functional.interpolate(..., align_corners=True):
        src = i * (in_size - 1) / (out_size - 1)
    """
    if out_size == 1:
        src = jnp.zeros((1,), dtype=jnp.float32)
    else:
        src = jnp.arange(out_size, dtype=jnp.float32) * (
            (in_size - 1) / (out_size - 1)
        )
    lo = jnp.clip(jnp.floor(src).astype(jnp.int32), 0, in_size - 1)
    hi = jnp.minimum(lo + 1, in_size - 1)
    w_hi = (src - lo.astype(jnp.float32)).astype(dtype)
    w_lo = (jnp.float32(1.0) - w_hi).astype(dtype)
    rows = jnp.arange(out_size)
    mat = jnp.zeros((out_size, in_size), dtype=dtype)
    mat = mat.at[rows, lo].add(w_lo)
    mat = mat.at[rows, hi].add(w_hi)
    return mat


def _choose_bc(nc: int, h: int, w: int, out_h: int, out_w: int) -> int:
    """Pick the channel-batch size Bc.

    Sized against a ~10 MiB block budget (double-buffered in/out blocks plus
    the broadcast H-matrix), which fits comfortably inside v7x's 64 MiB
    physical / 32 MiB default scoped VMEM as well as v5e/v6e.  Also keeps the
    grid length >= 2 when possible so both v7x TensorCores get work.
    """
    def tile_elems(rows, cols):  # (8,128)-padded element count of a 2D slice
        return ((rows + 7) // 8 * 8) * ((cols + 127) // 128 * 128)

    per_slice_bytes = 4 * (
        2 * tile_elems(h, w)            # x block, double-buffered
        + 2 * tile_elems(out_h, out_w)  # out block, double-buffered
        + 2 * tile_elems(out_h, h)      # broadcast wh block
    )
    budget = 10 * 1024 * 1024
    cap = max(1, budget // per_slice_bytes)
    bc = int(min(cap, 32, nc))
    # Keep >= 2 grid steps (v7x megacore) when there is more than one slice.
    if nc >= 2 and (nc + bc - 1) // bc < 2:
        bc = (nc + 1) // 2
    return bc


def _resize_kernel(whb_ref, ww_ref, x_ref, o_ref):
    """One channel-batch: out = (factor*Wh) @ x @ Ww, done as two MXU matmuls."""
    bc, h, w = x_ref.shape
    out_h = whb_ref.shape[1]
    out_w = ww_ref.shape[1]

    # Keep f32 for numerical parity with the torch module; on v6e/v7x the MXU
    # inputs could be cast to bf16 for extra throughput if the caller accepts
    # the precision loss.
    x = x_ref[...].astype(jnp.float32)

    # W-pass: single big matmul (Bc*H, W) @ (W, out_w).  Merging the leading
    # (batch, sublane) dims is layout-cheap.
    t = jnp.dot(
        x.reshape(bc * h, w),
        ww_ref[...].astype(jnp.float32),
        preferred_element_type=jnp.float32,
    )
    t = t.reshape(bc, h, out_w)

    # H-pass: batched MXU matmul over the channel batch.  The flow-rescale
    # factor is already folded into whb, so no extra VPU scaling pass.
    y = jnp.einsum(
        "boh,bhw->bow",
        whb_ref[...].astype(jnp.float32),
        t,
        preferred_element_type=jnp.float32,
    )

    o_ref[...] = y.astype(o_ref.dtype)


def resize_transform(x, vel_resize: float, ndims: int = 2):
    """Pallas equivalent of ResizeTransform(vel_resize, ndims).forward(x).

    x: (N, C, H, W) float array (NCHW, PyTorch convention).
    """
    if ndims != 2:
        # TODO(synk): 1-D ('linear') and 3-D ('trilinear') variants not implemented.
        raise NotImplementedError("only ndims=2 (bilinear) is implemented")

    factor = 1.0 / vel_resize
    if factor == 1.0:
        return x

    N, C, H, W = x.shape
    # Same output-size rule PyTorch uses when scale_factor is given.
    out_h = int(math.floor(H * factor))
    out_w = int(math.floor(W * factor))

    nc = N * C
    bc = _choose_bc(nc, H, W, out_h, out_w)
    nc_pad = (nc + bc - 1) // bc * bc

    # Separable interpolation matrices.  The rescale factor is folded into the
    # H matrix (mathematically identical to scale-then-interp / interp-then-
    # scale since interpolation is linear).
    wh = _interp_matrix(H, out_h) * jnp.float32(factor)   # (out_h, H)
    ww = _interp_matrix(W, out_w).T                       # (W, out_w)
    # Pre-broadcast on the host; constant block index => DMA'd into VMEM once.
    whb = jnp.broadcast_to(wh, (bc, out_h, H))

    xf = x.reshape(nc, H, W)
    if nc_pad != nc:
        xf = jnp.pad(xf, ((0, nc_pad - nc), (0, 0), (0, 0)))

    grid = (nc_pad // bc,)

    flops = 2 * nc_pad * (H * W * out_w + out_h * H * out_w)
    bytes_accessed = 4 * (
        nc_pad * H * W + nc_pad * out_h * out_w + bc * out_h * H + W * out_w
    )

    out = pl.pallas_call(
        _resize_kernel,
        out_shape=jax.ShapeDtypeStruct((nc_pad, out_h, out_w), x.dtype),
        grid_spec=pltpu.PrefetchScalarGridSpec(
            num_scalar_prefetch=0,
            grid=grid,
            in_specs=[
                pl.BlockSpec((bc, out_h, H), lambda i: (0, 0, 0)),   # whb (const)
                pl.BlockSpec((W, out_w), lambda i: (0, 0)),          # ww  (const)
                pl.BlockSpec((bc, H, W), lambda i: (i, 0, 0)),       # x
            ],
            out_specs=pl.BlockSpec((bc, out_h, out_w), lambda i: (i, 0, 0)),
        ),
        compiler_params=pltpu.CompilerParams(
            dimension_semantics=("parallel",),
            vmem_limit_bytes=32 * 1024 * 1024,
        ),
        cost_estimate=pl.CostEstimate(
            flops=flops, transcendentals=0, bytes_accessed=bytes_accessed
        ),
    )(whb, ww, xf)

    if nc_pad != nc:
        out = out[:nc]
    return out.reshape(N, C, out_h, out_w)


def _reference(x, vel_resize):
    """Pure-JAX reference mirroring the torch scale/interp ordering."""
    factor = 1.0 / vel_resize
    N, C, H, W = x.shape
    out_h = int(math.floor(H * factor))
    out_w = int(math.floor(W * factor))
    wh = _interp_matrix(H, out_h)
    ww = _interp_matrix(W, out_w)
    if factor > 1.0:
        y = jnp.einsum("oh,nchw,pw->ncop", wh, factor * x, ww)
    else:
        y = factor * jnp.einsum("oh,nchw,pw->ncop", wh, x, ww)
    return y


if __name__ == "__main__":
    key = jax.random.PRNGKey(0)
    x = jax.random.normal(key, (2, 4, 16, 16), dtype=jnp.float32)

    # Upsample path (factor = 2 > 1): scale then resize, 16x16 -> 32x32.
    y = jax.block_until_ready(resize_transform(x, vel_resize=0.5, ndims=2))
    assert y.shape == (2, 4, 32, 32), y.shape
    assert jnp.allclose(y, _reference(x, 0.5), rtol=2e-2, atol=2e-2)

    # Downsample path (factor = 0.5 < 1): resize then scale, 16x16 -> 8x8.
    y2 = jax.block_until_ready(resize_transform(x, vel_resize=2.0, ndims=2))
    assert y2.shape == (2, 4, 8, 8), y2.shape
    assert jnp.allclose(y2, _reference(x, 2.0), rtol=2e-2, atol=2e-2)

    # Channel count not divisible by the channel batch (exercises padding path).
    x3 = jax.random.normal(jax.random.PRNGKey(1), (1, 3, 16, 16), dtype=jnp.float32)
    y3 = jax.block_until_ready(resize_transform(x3, vel_resize=0.5, ndims=2))
    assert y3.shape == (1, 3, 32, 32), y3.shape
    assert jnp.allclose(y3, _reference(x3, 0.5), rtol=2e-2, atol=2e-2)

    print("KERNEL_OK")
</pallas_src>

<mosaic_0001>
module attributes {stable_mosaic.version = 11 : i64} {
  func.func @_resize_kernel(%arg0: i32, %arg1: memref<4x32x16xf32, #tpu.memory_space<vmem>>, %arg2: memref<16x32xf32, #tpu.memory_space<vmem>>, %arg3: memref<4x16x16xf32, #tpu.memory_space<vmem>>, %arg4: memref<4x32x32xf32, #tpu.memory_space<vmem>>) attributes {dimension_semantics = [#tpu.dimension_semantics<parallel>], iteration_bounds = array<i64: 2>, scalar_prefetch = 0 : i64, scratch_operands = 0 : i64, tpu.core_type = #tpu.core_type<tc>, window_params = [{pipeline_mode = #tpu.pipeline_mode<synchronous>, transform_indices = @transform_0, window_bounds = array<i64: 4, 32, 16>}, {pipeline_mode = #tpu.pipeline_mode<synchronous>, transform_indices = @transform_1, window_bounds = array<i64: 16, 32>}, {transform_indices = @transform_2, window_bounds = array<i64: 4, 16, 16>}, {transform_indices = @transform_3, window_bounds = array<i64: 4, 32, 32>}]} {
    %c0 = arith.constant 0 : index
    %c0_0 = arith.constant 0 : index
    %c0_1 = arith.constant 0 : index
    %0 = vector.load %arg3[%c0, %c0_0, %c0_1] : memref<4x16x16xf32, #tpu.memory_space<vmem>>, vector<4x16x16xf32>
    %1 = vector.shape_cast %0 : vector<4x16x16xf32> to vector<64x16xf32>
    %c0_2 = arith.constant 0 : index
    %c0_3 = arith.constant 0 : index
    %2 = vector.load %arg2[%c0_2, %c0_3] : memref<16x32xf32, #tpu.memory_space<vmem>>, vector<16x32xf32>
    %cst = arith.constant dense<0.000000e+00> : vector<64x32xf32>
    %3 = tpu.matmul %1, %2, %cst {dimension_numbers = #tpu.dot_dimension_numbers<[1], [0], [0], [1], [0, 0, 1, 1], [], []>} : vector<64x16xf32>, vector<16x32xf32>, vector<64x32xf32> -> vector<64x32xf32>
    %4 = vector.shape_cast %3 : vector<64x32xf32> to vector<4x16x32xf32>
    %c0_4 = arith.constant 0 : index
    %c0_5 = arith.constant 0 : index
    %c0_6 = arith.constant 0 : index
    %5 = vector.load %arg1[%c0_4, %c0_5, %c0_6] : memref<4x32x16xf32, #tpu.memory_space<vmem>>, vector<4x32x16xf32>
    "tpu.trace_start"() <{level = 10 : i32, message = "boh,bhw->bow"}> : () -> ()
    %cst_7 = arith.constant dense<0.000000e+00> : vector<4x32x32xf32>
    %6 = tpu.matmul %5, %4, %cst_7 {dimension_numbers = #tpu.dot_dimension_numbers<[2], [1], [1], [2], [0, 0, 0, 1, 1, 2], [0], [0]>} : vector<4x32x16xf32>, vector<4x16x32xf32>, vector<4x32x32xf32> -> vector<4x32x32xf32>
    "tpu.trace_stop"() : () -> ()
    %c0_8 = arith.constant 0 : index
    %c0_9 = arith.constant 0 : index
    %c0_10 = arith.constant 0 : index
    %7 = vector.load %arg4[%c0_8, %c0_9, %c0_10] : memref<4x32x32xf32, #tpu.memory_space<vmem>>, vector<4x32x32xf32>
    tpu.vector_store %arg4[%c0_8, %c0_9, %c0_10], %6 {strides = array<i32>} : memref<4x32x32xf32, #tpu.memory_space<vmem>>, vector<4x32x32xf32>,
    return
  }
  func.func @transform_0(%arg0: i32) -> (i32, i32, i32) {
    %c0_i32 = arith.constant 0 : i32
    %c0_i32_0 = arith.constant 0 : i32
    %c0_i32_1 = arith.constant 0 : i32
    %c0_i32_2 = arith.constant 0 : i32
    return %c0_i32, %c0_i32_0, %c0_i32_1 : i32, i32, i32
  }
  func.func @transform_1(%arg0: i32) -> (i32, i32) {
    %c0_i32 = arith.constant 0 : i32
    %c0_i32_0 = arith.constant 0 : i32
    %c0_i32_1 = arith.constant 0 : i32
    return %c0_i32, %c0_i32_0 : i32, i32
  }
  func.func @transform_2(%arg0: i32) -> (i32, i32, i32) {
    %c0_i32 = arith.constant 0 : i32
    %c0_i32_0 = arith.constant 0 : i32
    %c0_i32_1 = arith.constant 0 : i32
    return %arg0, %c0_i32, %c0_i32_0 : i32, i32, i32
  }
  func.func @transform_3(%arg0: i32) -> (i32, i32, i32) {
    %c0_i32 = arith.constant 0 : i32
    %c0_i32_0 = arith.constant 0 : i32
    %c0_i32_1 = arith.constant 0 : i32
    return %arg0, %c0_i32, %c0_i32_0 : i32, i32, i32
  }
}

</mosaic_0001>

<bundles_post_ra>
// kernel: tpu_custom_call.1
= control target key start
LH: loop header
LB: loop body
LE: loop exit
PB: predicated region body
PF: predicated region fallthrough
CT: control target
= control target key end

     0   :  { %8 = vsyncpa [#allocation3], 0  ;;  %s900_s0 = inlined_call_operand.vmem [shape: f32[4,32,16], index: 0, kind: input, shape index: {}]   ;;  %s901_s1 = inlined_call_operand.vmem [shape: f32[16,32], index: 1, kind: input, shape index: {}]   ;;  %s902_s2 = inlined_call_operand.vmem [shape: f32[8,16,16], index: 2, kind: input, shape index: {}]   ;;  %s903_s3 = inlined_call_operand.hbm [shape: f32[8,32,32], index: 3, kind: output, shape index: {}]  }
   0x1   :  { %10 = vsyncpa [#allocation3 + $0x1], 0  ;;  %s699_s12 = smov 0   ;;  %s701_s13 = smov 0  }
   0x2   :  { %s703_s14 = smov 0   ;;  %s705_s15 = smov 0  }
   0x3 LB: > { %s720_s16 = sadd.s32 4294967295, %s675_s15   ;;  %s527_s17 = sadd.s32 4294967294, %s675_s15   ;;  %s675_s15 = sphi %s705_s15, %s909_s15   ;;  %s671_s14 = sphi %s703_s14, %s908_s14   ;;  %s667_s13 = sphi %s701_s13, %s907_s13   ;;  %s663_s12 = sphi %s699_s12, %s906_s12  }
   0x4   : > { %s724_s18 = sadd.s32 1, %s675_s15   ;;  %s91_s19 = sadd.s32 1, %s671_s14 }
   0x5   : > { %s88_s20 = ssub.s32 %s675_s15, %s724_s18  ;;  %p101_p0 = scmp.ne.s32.totalorder %s671_s14, %s667_s13 }
   0x6   : > { %p89_p1 = scmp.eq.s32.totalorder %s88_s20, 0  ;;  %p102_p2 = scmp.eq.s32.totalorder %s720_s16, 1 }
   0x7   : > { %p107_p3 = scmp.ne.s32.totalorder %s667_s13, %s663_s12  ;;  %p108_p4 = scmp.eq.s32.totalorder %s527_s17, 1 }
   0x8   : > { %s735_s21 = scalar_select %p89_p1, %s671_s14, %s91_s19  }
   0x9   : > { %p737_p5 = por %p102_p2, %p101_p0  ;;  %p741_p6 = por %p108_p4, %p107_p3 }
   0xa   : > { %p530_p7 = scmp.ge.s32.totalorder %s675_s15, 1  ;;  %p142_p8 = scmp.lt.s32.totalorder %s675_s15, 3 }
   0xc   : > { %p143_p9 = pnand %p530_p7, %p142_p8 }
   0xd   : > { %s532_s28 = sshll.u32 (!%p143_p9), %s720_s16, 2  ;;  %s633_s24 = scalar_lea.hbm (!%p143_p9), %s903_s3, 256 }
   0xe   : > { %146 = sbr.rel (%p143_p9) target bundleno = 352 (0x160), region = 32  ;;  %p168_p10 = scmp.lt.s32.totalorder (!%p143_p9), %s532_s28, 7 }
  0x13   : > { %v184_v0 = vld [vmem:[%s901_s1 + $0x8] sm:$0xff]  ;;  %v183_v1 = vld [vmem:[%s901_s1] sm:$0xff]  ;;  %s911_s28 = smov (!%p168_p10, %s532_s28), 7  ;;  %vm185_vm0 = vcmask 130048   ;;  %v253_v13 = vld [vmem:[%s900_s0 + $0x10] sm:$0xff]  ;;  %vm431_vm1 = vcmask 261120  }
  0x14   : > { %224 = vmatpush.msra.mxu0 %v184_v0  ;;  %568 = vmatpush.msra.mxu2 %v184_v0  ;;  %s565_s29 = sshll.u32 %s911_s28, 4  ;;  %v251_v14 = vld [vmem:[%s900_s0] sm:$0xff]  ;;  %v254_v17 = vld [vmem:[%s900_s0 + $0x18] sm:$0xff]  ;;  %v252_v18 = vld [vmem:[%s900_s0 + $0x8] sm:$0xff] }
  0x15   : > { %s172_s5 = scalar_lea.vmem %s902_s2, %s565_s29  ;;  %v255_v20 = vld [vmem:[%s900_s0 + $0x20] sm:$0xff]  ;;  %v256_v23 = vld [vmem:[%s900_s0 + $0x28] sm:$0xff]  ;;  %v257_v27 = vld [vmem:[%s900_s0 + $0x30] sm:$0xff]  ;;  %s164_s29 = sand.u32 1, %s667_s13  }
  0x16   : > { %225 = vmatpush.msra.mxu0 %v183_v1  ;;  %569 = vmatpush.msra.mxu2 %v183_v1  ;;  %v175_v2 = vld [vmem:[%s172_s5] sm:$0xff]  ;;  %v181_v3 = vld [vmem:[%s172_s5 + $0x30] sm:$0xff]  ;;  %v176_v4 = vld [vmem:[%s172_s5 + $0x8] sm:$0xff]  ;;  %s531_s30 = sshll.u32 %s164_s29, 7  ;;  %s449_s11 = scalar_lea.sflag [#allocation3], %s164_s29 }
  0x17   : > { %535 = vmatmul.msk.f32.vlgmr.msra.gmra.mxu0 %vm185_vm0, %v175_v2  ;;  %541 = vmatmul.msk.f32.vlgmr.msra.gmra.mxu2 %vm185_vm0, %v181_v3  ;;  %v182_v5 = vld [vmem:[%s172_s5 + $0x38] sm:$0xff]  ;;  %v177_v6 = vld [vmem:[%s172_s5 + $0x10] sm:$0xff]  ;;  %v179_v8 = vld [vmem:[%s172_s5 + $0x20] sm:$0xff]  ;;  %s832_s4 = scalar_lea.vmem [#allocation2], %s531_s30 }
  0x18   : > { %v178_v7 = vld [vmem:[%s172_s5 + $0x18] sm:$0xff]  ;;  %v180_v9 = vld [vmem:[%s172_s5 + $0x28] sm:$0xff]  ;;  %v263_v21 = vld [vmem:[%s900_s0 + $0x60] sm:$0xff]  ;;  %s567_s5 = sshll.u32 %s720_s16, 7  ;;  %s462_s9 = sshll.u32 %s832_s4, 4  ;;  %s463_s9 = int_to_ptr.vmem [resolvable:$true] %s462_s9 }
  0x19   : > { %v264_v24 = vld [vmem:[%s900_s0 + $0x68] sm:$0xff]  ;;  %v259_v26 = vld [vmem:[%s900_s0 + $0x40] sm:$0xff]  ;;  %v265_v28 = vld [vmem:[%s900_s0 + $0x70] sm:$0xff]  ;;  %s461_s8 = scalar_lea.hbm %s903_s3, %s567_s5 }
  0x1a   : > { %v260_v29 = vld [vmem:[%s900_s0 + $0x48] sm:$0xff]  ;;  %v258_v30 = vld [vmem:[%s900_s0 + $0x38] sm:$0xff]  ;;  %v261_v32 = vld [vmem:[%s900_s0 + $0x50] sm:$0xff]  ;;  %s464_s10 = sshll.u32 %s461_s8, 4  ;;  %s465_s10 = int_to_ptr.hbm [resolvable:$true] %s464_s10 }
  0x1b   : > { %v266_v31 = vld [vmem:[%s900_s0 + $0x78] sm:$0xff]  ;;  %s627_s17 = sshra.s32 %s465_s10, 4  ;;  %s628_s17 = int_to_ptr.hbm [resolvable:$true] %s627_s17 }
  0x1c   : > { %v262_v33 = vld [vmem:[%s900_s0 + $0x58] sm:$0xff]  ;;  %s629_s19 = scalar_lea.hbm %s628_s17, 128  ;;  %p634_p0 = scmp.lt.s32.totalorder %s628_s17, %s903_s3 }
  0x1d   : > { %p630_p11 = scmp.ne.s32.totalorder %s628_s17, %s629_s19  ;;  %p635_p1 = scmp.lt.s32.totalorder %s633_s24, %s629_s19 }
  0x1f   : > { %536 = vmatmul.msk.f32.gmra.mxu0 %vm185_vm0, %v176_v4  ;;  %542 = vmatmul.msk.f32.gmra.mxu2 %vm185_vm0, %v182_v5  ;;  %p631_p12 = pnand %p630_p11, %p737_p5  ;;  %p636_p2 = por %p635_p1, %p634_p0 }
  0x21   : > { %p632_p13 = pneg %p631_p12 }
  0x23   : > { %p637_p3 = pnand %p636_p2, %p632_p13 }
  0x27   : > { %537 = vmatmul.msk.f32.gmra.mxu0 %vm185_vm0, %v177_v6 }
  0x2f   : > { %538 = vmatmul.msk.f32.gmra.mxu0 %vm185_vm0, %v178_v7 }
  0x37   : > { %539 = vmatmul.msk.f32.gmra.mxu0 %vm185_vm0, %v179_v8 }
  0x3f   : > { %540 = vmatmul.msk.f32.gmra.mxu0 %vm185_vm0, %v180_v9 }
  0x94   : > { %v227_v10 = vpop.f32.mrf.mxu0 }
  0x9a   : > { %v245_v11 = vpop.f32.mrf.mxu2 }
  0x9c   : > { %v230_v12 = vpop.f32.mrf.mxu0 }
  0x9d   : > { %293 = vmatpush.msra.mxu1 %v230_v12  ;;  %570 = vmatpush.msra.mxu3 %v230_v12 }
  0x9f   : > { %294 = vmatpush.msra.mxu1 %v227_v10  ;;  %571 = vmatpush.msra.mxu3 %v227_v10 }
  0xa0   : > { %545 = vmatmul.msk.f32.vlgmr.msra.gmra.mxu3 %vm185_vm0, %v253_v13  ;;  %543 = vmatmul.msk.f32.vlgmr.msra.gmra.mxu1 %vm185_vm0, %v251_v14 }
  0xa2   : > { %v248_v15 = vpop.f32.mrf.mxu2 }
  0xa3   : > { %416 = vmatpush.msrb.mxu1 %v248_v15 }
  0xa4   : > { %v233_v16 = vpop.f32.mrf.mxu0 }
  0xa5   : > { %417 = vmatpush.msrb.mxu1 %v245_v11 }
  0xa8   : > { %546 = vmatmul.msk.f32.gmra.mxu3 %vm185_vm0, %v254_v17  ;;  %544 = vmatmul.msk.f32.gmra.mxu1 %vm185_vm0, %v252_v18 }
  0xac   : > { %v236_v19 = vpop.f32.mrf.mxu0 }
  0xad   : > { %334 = vmatpush.msrb.mxu2 %v236_v19 }
  0xaf   : > { %335 = vmatpush.msrb.mxu2 %v233_v16 }
  0xb0   : > { %547 = vmatmul.msk.f32.vlgmr.msrb.gmra.mxu2 %vm185_vm0, %v255_v20  ;;  %555 = vmatmul.msk.f32.vlgmr.msrb.gmra.mxu1 %vm185_vm0, %v263_v21 }
  0xb4   : > { %v239_v22 = vpop.f32.mrf.mxu0 }
  0xb8   : > { %548 = vmatmul.msk.f32.gmra.mxu2 %vm185_vm0, %v256_v23  ;;  %556 = vmatmul.msk.f32.gmra.mxu1 %vm185_vm0, %v264_v24 }
  0xbc   : > { %v242_v25 = vpop.f32.mrf.mxu0 }
  0xbd   : > { %375 = vmatpush.msrb.mxu3 %v242_v25 }
  0xbf   : > { %376 = vmatpush.msrb.mxu3 %v239_v22 }
  0xc0   : > { %551 = vmatmul.msk.f32.vlgmr.msrb.gmra.mxu3 %vm185_vm0, %v259_v26  ;;  %549 = vmatmul.msk.f32.gmra.mxu2 %vm185_vm0, %v257_v27 }
  0xc1   : > { %557 = vmatmul.msk.f32.gmra.mxu1 %vm185_vm0, %v265_v28 }
  0xc8   : > { %552 = vmatmul.msk.f32.gmra.mxu3 %vm185_vm0, %v260_v29  ;;  %550 = vmatmul.msk.f32.gmra.mxu2 %vm185_vm0, %v258_v30 }
  0xc9   : > { %558 = vmatmul.msk.f32.gmra.mxu1 %vm185_vm0, %v266_v31 }
  0xd0   : > { %553 = vmatmul.msk.f32.gmra.mxu3 %vm185_vm0, %v261_v32 }
  0xd8   : > { %554 = vmatmul.msk.f32.gmra.mxu3 %vm185_vm0, %v262_v33 }
 0x11d   : > { %v296_v34 = vpop.f32.mrf.mxu1 }
 0x11e   : > { %432 = vst.msk [vmem:[%s832_s4] sm:$0xff] %vm431_vm1, %v296_v34 }
 0x123   : > { %v302_v35 = vpop.f32.mrf.mxu3 }
 0x124   : > { %434 = vst.msk [vmem:[%s832_s4 + $0x10] sm:$0xff] %vm431_vm1, %v302_v35 }
 0x125   : > { %v299_v36 = vpop.f32.mrf.mxu1 }
 0x126   : > { %433 = vst.msk [vmem:[%s832_s4 + $0x8] sm:$0xff] %vm431_vm1, %v299_v36 }
 0x12b   : > { %v305_v37 = vpop.f32.mrf.mxu3 }
 0x12c   : > { %435 = vst.msk [vmem:[%s832_s4 + $0x18] sm:$0xff] %vm431_vm1, %v305_v37 }
 0x12d   : > { %v419_v38 = vpop.f32.mrf.mxu1 }
 0x12e   : > { %444 = vst.msk [vmem:[%s832_s4 + $0x60] sm:$0xff] %vm431_vm1, %v419_v38 }
 0x133   : > { %v337_v39 = vpop.f32.mrf.mxu2 }
 0x134   : > { %436 = vst.msk [vmem:[%s832_s4 + $0x20] sm:$0xff] %vm431_vm1, %v337_v39 }
 0x135   : > { %v422_v40 = vpop.f32.mrf.mxu1 }
 0x136   : > { %445 = vst.msk [vmem:[%s832_s4 + $0x68] sm:$0xff] %vm431_vm1, %v422_v40 }
 0x13b   : > { %v340_v41 = vpop.f32.mrf.mxu2 }
 0x13c   : > { %437 = vst.msk [vmem:[%s832_s4 + $0x28] sm:$0xff] %vm431_vm1, %v340_v41 }
 0x13e   : > { %v425_v42 = vpop.f32.mrf.mxu1 }
 0x13f   : > { %446 = vst.msk [vmem:[%s832_s4 + $0x70] sm:$0xff] %vm431_vm1, %v425_v42 }
 0x143   : > { %v378_v43 = vpop.f32.mrf.mxu3  ;;  %v343_v44 = vpop.f32.mrf.mxu2 }
 0x144   : > { %440 = vst.msk [vmem:[%s832_s4 + $0x40] sm:$0xff] %vm431_vm1, %v378_v43 }
 0x145   : > { %438 = vst.msk [vmem:[%s832_s4 + $0x30] sm:$0xff] %vm431_vm1, %v343_v44 }
 0x146   : > { %v428_v45 = vpop.f32.mrf.mxu1 }
 0x147   : > { %447 = vst.msk [vmem:[%s832_s4 + $0x78] sm:$0xff] %vm431_vm1, %v428_v45 }
 0x14b   : > { %v381_v46 = vpop.f32.mrf.mxu3  ;;  %v346_v47 = vpop.f32.mrf.mxu2 }
 0x14c   : > { %441 = vst.msk [vmem:[%s832_s4 + $0x48] sm:$0xff] %vm431_vm1, %v381_v46 }
 0x14d   : > { %439 = vst.msk [vmem:[%s832_s4 + $0x38] sm:$0xff] %vm431_vm1, %v346_v47 }
 0x153   : > { %v384_v48 = vpop.f32.mrf.mxu3 }
 0x154   : > { %442 = vst.msk [vmem:[%s832_s4 + $0x50] sm:$0xff] %vm431_vm1, %v384_v48 }
 0x15b   : > { %v387_v49 = vpop.f32.mrf.mxu3 }
 0x15c   : > { %443 = vst.msk [vmem:[%s832_s4 + $0x58] sm:$0xff] %vm431_vm1, %v387_v49 }
 0x15d   : > { %640 = shalt.err (!%p637_p3)
}
 0x15e   : > { %s677_s27 = smov 128   ;;  %s678_s28 = smov 8  }
 0x15f   : > { %572 = dma.vmem_to_hbm [thread:$0]  (%p737_p5), %s463_s9, 2048, %s465_s10, %s449_s11, %s677_s27, %s677_s27, %s678_s28  }
 0x160 PF: > { %p578_p4 = scmp.ge.s32.totalorder %s675_s15, 2  ;;  %s479_s29 = sand.u32 1, %s663_s12  }
 0x161   : > { %s480_s30 = scalar_lea.sflag [#allocation3], %s479_s29 }
 0x162   : > { %p575_p7 = pnand %p578_p4, %p741_p6 }
 0x164   : > { %p576_p8 = pneg %p575_p7 }
 0x166   : > { %658 = dma.done.wait (%p576_p8), %s480_s30, 2048  }
 0x167   : > { %660 = vsyncadd (%p576_p8), %s480_s30, 4294965248  ;;  %p13_p9 = scmp.ge.s32.totalorder %s724_s18, 4   ;;  %s906_s12 = smov %s667_s13 }
 0x168   : > { %s907_s13 = smov %s671_s14  ;;  %s908_s14 = smov %s735_s21 }
 0x169   : > { %s909_s15 = smov %s724_s18  ;;  %15 = sbr.rel (!%p13_p9) target bundleno = 3 (0x3), region = 67 }
 0x16e   :  { %486 = vsyncpa [#allocation3], 1 }
 0x16f   :  { %488 = vsyncpa [#allocation3 + $0x1], 1 }

</bundles_post_ra>
